<compile_context>
chip_gen: v6e
topology: v6e:2x2x1
jax: 0.10.0
libtpu: 0.0.40
codegen_flags: <defaults>
</compile_context>

<pallas_src>
import functools

import jax
import jax.numpy as jnp
from jax.experimental import pallas as pl
from jax.experimental.pallas import tpu as pltpu

LANE = 128


def _round_up(x, m):
    return ((x + m - 1) // m) * m


# ----------------------------------------------------------------------------
# Pallas kernel: fused MLPBase forward + critic_linear + Categorical head +
# deterministic-action distribution post-processing.
# ----------------------------------------------------------------------------
def policy_act_kernel(
    x_ref,                      # (TB, D)     observation tile
    w1_ref, b1_ref,             # (D, HP)   , (1, HP)    fused layer-1  [actor|critic]
    w2_ref, b2_ref,             # (HP, HP)  , (1, HP)    block-diag layer-2
    wh_ref, bh_ref,             # (HP, HW)  , (1, HW)    fused heads [logits | value | 0-pad]
    out_ref,                    # (TB, HW)    packed: lane0=value, lane1=action,
                                #             lane2=action_log_prob, lane3=entropy
    *,
    num_actions,
):
    # ---- fused actor+critic MLP (3 lane-dense MXU matmuls, f32 accumulate) ----
    x = x_ref[...].astype(w1_ref.dtype)
    h1 = jnp.tanh(
        jnp.dot(x, w1_ref[...], preferred_element_type=jnp.float32) + b1_ref[...]
    )
    h2 = jnp.tanh(
        jnp.dot(h1.astype(w2_ref.dtype), w2_ref[...],
                preferred_element_type=jnp.float32) + b2_ref[...]
    )
    head = (
        jnp.dot(h2.astype(wh_ref.dtype), wh_ref[...],
                preferred_element_type=jnp.float32) + bh_ref[...]
    )

    lane = jax.lax.broadcasted_iota(jnp.int32, head.shape, 1)
    is_logit = lane < num_actions

    # value sits in lane `num_actions` of the fused head output
    value = jnp.sum(jnp.where(lane == num_actions, head, 0.0),
                    axis=-1, keepdims=True)

    # ---- Categorical distribution (deterministic mode) -----------------------
    neg_big = jnp.float32(-1e30)
    masked = jnp.where(is_logit, head, neg_big)
    m = jnp.max(masked, axis=-1, keepdims=True)
    e = jnp.where(is_logit, jnp.exp(head - m), 0.0)
    s = jnp.sum(e, axis=-1, keepdims=True)
    log_s = jnp.log(s)

    # argmax (first occurrence on ties) without relying on lax.argmax lowering
    idx = jnp.where((masked == m) & is_logit, lane, LANE)
    action = jnp.min(idx, axis=-1, keepdims=True).astype(jnp.float32)

    # log-prob of the argmax action == max(log_softmax) == -log(sum(exp(l - max)))
    action_logp = -log_s

    # per-row entropy  -sum(p * log p)
    p = e * pl.reciprocal(s, approx=True)
    logp = head - m - log_s
    ent = -jnp.sum(jnp.where(is_logit, p * logp, 0.0), axis=-1, keepdims=True)

    # ---- single lane-dense packed store --------------------------------------
    packed = (
        jnp.where(lane == 0, value, 0.0)
        + jnp.where(lane == 1, action, 0.0)
        + jnp.where(lane == 2, action_logp, 0.0)
        + jnp.where(lane == 3, ent, 0.0)
    )
    out_ref[...] = packed.astype(out_ref.dtype)


# ----------------------------------------------------------------------------
# Wrapper: batch-gridded pallas_call.
# ----------------------------------------------------------------------------
def _policy_act_call(x, fp, num_actions):
    B, D = x.shape
    HW = fp["wh"].shape[1]

    TB = min(256, _round_up(B, 8))
    B_pad = _round_up(B, TB)
    if B_pad != B:
        x = jnp.pad(x, ((0, B_pad - B), (0, 0)))
    grid = (B_pad // TB,)

    def resident(shape):
        # weights stay VMEM-resident across batch-grid steps
        return pl.BlockSpec(shape, lambda i: (0, 0))

    packed = pl.pallas_call(
        functools.partial(policy_act_kernel, num_actions=num_actions),
        out_shape=jax.ShapeDtypeStruct((B_pad, HW), jnp.float32),
        grid_spec=pltpu.PrefetchScalarGridSpec(
            num_scalar_prefetch=0,
            grid=grid,
            in_specs=[
                pl.BlockSpec((TB, D), lambda i: (i, 0)),
                resident(fp["w1"].shape), resident(fp["b1"].shape),
                resident(fp["w2"].shape), resident(fp["b2"].shape),
                resident(fp["wh"].shape), resident(fp["bh"].shape),
            ],
            out_specs=pl.BlockSpec((TB, HW), lambda i: (i, 0)),
        ),
        compiler_params=pltpu.CompilerParams(
            dimension_semantics=("parallel",)),
    )(x, fp["w1"], fp["b1"], fp["w2"], fp["b2"], fp["wh"], fp["bh"])
    return packed[:B]


@functools.partial(jax.jit, static_argnames=("num_actions",))
def policy_act(x, rnn_hxs, masks, fused_params, *, num_actions):
    """Policy.act(deterministic=True) for non-recurrent MLPBase + Discrete dist."""
    # TODO(synk): recurrent GRU path (_forward_gru) not implemented (non-recurrent base).
    # TODO(synk): stochastic dist.sample() not implemented; deterministic argmax only.
    del masks  # unused for non-recurrent MLPBase
    packed = _policy_act_call(x, fused_params, num_actions)
    value = packed[:, 0:1]
    action = packed[:, 1:2].astype(jnp.int32)
    action_log_probs = packed[:, 2:3]
    dist_entropy = packed[:, 3].mean()
    return value, action, action_log_probs, dist_entropy, rnn_hxs


# ----------------------------------------------------------------------------
# Deterministic parameter init (mirrors nn.init.orthogonal_ + zero bias),
# then one-time fusion into lane-dense blocks.
# ----------------------------------------------------------------------------
def orthogonal(key, shape, gain=1.0, dtype=jnp.float32):
    n_rows, n_cols = shape
    big, small = max(n_rows, n_cols), min(n_rows, n_cols)
    a = jax.random.normal(key, (big, small), dtype=jnp.float32)
    q, r = jnp.linalg.qr(a)
    q = q * jnp.sign(jnp.diagonal(r))
    if n_rows < n_cols:
        q = q.T
    return (gain * q[:n_rows, :n_cols]).astype(dtype)


def make_params(num_inputs, hidden_size, num_actions, key):
    ks = jax.random.split(key, 6)
    g = jnp.sqrt(2.0)  # np.sqrt(2) gain used in MLPBase
    return {
        "wa1": orthogonal(ks[0], (num_inputs, hidden_size), gain=g),
        "ba1": jnp.zeros((1, hidden_size), jnp.float32),
        "wa2": orthogonal(ks[1], (hidden_size, hidden_size), gain=g),
        "ba2": jnp.zeros((1, hidden_size), jnp.float32),
        "wc1": orthogonal(ks[2], (num_inputs, hidden_size), gain=g),
        "bc1": jnp.zeros((1, hidden_size), jnp.float32),
        "wc2": orthogonal(ks[3], (hidden_size, hidden_size), gain=g),
        "bc2": jnp.zeros((1, hidden_size), jnp.float32),
        "wv": orthogonal(ks[4], (hidden_size, 1), gain=1.0),
        "bv": jnp.zeros((1, 1), jnp.float32),
        "wd": orthogonal(ks[5], (hidden_size, num_actions), gain=0.01),
        "bd": jnp.zeros((1, num_actions), jnp.float32),
    }


def fuse_params(p, num_actions, weight_dtype=jnp.bfloat16):
    D, H = p["wa1"].shape
    HP = _round_up(2 * H, LANE)              # fused (padded) hidden width
    HW = _round_up(num_actions + 1, LANE)    # fused (padded) head width

    w1 = jnp.zeros((D, HP), jnp.float32)
    w1 = w1.at[:, :H].set(p["wa1"]).at[:, H:2 * H].set(p["wc1"])
    b1 = jnp.zeros((1, HP), jnp.float32)
    b1 = b1.at[:, :H].set(p["ba1"]).at[:, H:2 * H].set(p["bc1"])

    w2 = jnp.zeros((HP, HP), jnp.float32)
    w2 = w2.at[:H, :H].set(p["wa2"]).at[H:2 * H, H:2 * H].set(p["wc2"])
    b2 = jnp.zeros((1, HP), jnp.float32)
    b2 = b2.at[:, :H].set(p["ba2"]).at[:, H:2 * H].set(p["bc2"])

    wh = jnp.zeros((HP, HW), jnp.float32)
    wh = wh.at[:H, :num_actions].set(p["wd"])                           # actor -> logits
    wh = wh.at[H:2 * H, num_actions:num_actions + 1].set(p["wv"])       # critic -> value
    bh = jnp.zeros((1, HW), jnp.float32)
    bh = bh.at[:, :num_actions].set(p["bd"])
    bh = bh.at[:, num_actions:num_actions + 1].set(p["bv"])

    return {
        "w1": w1.astype(weight_dtype), "b1": b1,
        "w2": w2.astype(weight_dtype), "b2": b2,
        "wh": wh.astype(weight_dtype), "bh": bh,
    }


# ----------------------------------------------------------------------------
# Plain-JAX reference (f32, unfused) for a loose sanity check.
# ----------------------------------------------------------------------------
def reference_act(x, p):
    ha = jnp.tanh(jnp.tanh(x @ p["wa1"] + p["ba1"]) @ p["wa2"] + p["ba2"])
    hc = jnp.tanh(jnp.tanh(x @ p["wc1"] + p["bc1"]) @ p["wc2"] + p["bc2"])
    value = hc @ p["wv"] + p["bv"]
    logits = ha @ p["wd"] + p["bd"]
    logp = jax.nn.log_softmax(logits, axis=-1)
    probs = jnp.exp(logp)
    action = jnp.argmax(logits, axis=-1, keepdims=True)
    alp = jnp.take_along_axis(logp, action, axis=-1)
    ent = -(probs * logp).sum(-1).mean()
    return value, action, alp, ent


if __name__ == "__main__":
    B, D, H, A = 8, 16, 64, 6   # batch, obs dim (1-D obs -> MLPBase), hidden, actions

    key = jax.random.PRNGKey(0)
    k_params, k_obs = jax.random.split(key)

    params = make_params(D, H, A, k_params)
    fused = fuse_params(params, A)

    obs = jax.random.normal(k_obs, (B, D), dtype=jnp.float32)
    rnn_hxs = jnp.zeros((B, 1), jnp.float32)   # recurrent_hidden_state_size == 1
    masks = jnp.ones((B, 1), jnp.float32)

    value, action, action_log_probs, dist_entropy, rnn_hxs_out = policy_act(
        obs, rnn_hxs, masks, fused, num_actions=A
    )
    jax.block_until_ready((value, action, action_log_probs, dist_entropy, rnn_hxs_out))

    assert value.shape == (B, 1)
    assert action.shape == (B, 1)
    assert action_log_probs.shape == (B, 1)
    assert rnn_hxs_out.shape == (B, 1)
    assert bool(jnp.isfinite(value).all())
    assert bool(jnp.isfinite(action_log_probs).all())
    assert bool(jnp.isfinite(dist_entropy))

    # Loose sanity check against an f32 unfused reference (bf16 weights -> tolerance).
    v_ref, a_ref, alp_ref, ent_ref = reference_act(obs, params)
    assert bool(jnp.max(jnp.abs(value - v_ref)) < 0.15)
    assert bool(jnp.max(jnp.abs(action_log_probs - alp_ref)) < 0.05)
    assert bool(jnp.abs(dist_entropy - ent_ref) < 0.05)

    print("KERNEL_OK")
</pallas_src>

<mosaic_0001>
module attributes {stable_mosaic.version = 11 : i64} {
  func.func @policy_act_kernel(%arg0: i32, %arg1: memref<8x16xf32, #tpu.memory_space<vmem>>, %arg2: memref<16x128xbf16, #tpu.memory_space<vmem>>, %arg3: memref<1x128xf32, #tpu.memory_space<vmem>>, %arg4: memref<128x128xbf16, #tpu.memory_space<vmem>>, %arg5: memref<1x128xf32, #tpu.memory_space<vmem>>, %arg6: memref<128x128xbf16, #tpu.memory_space<vmem>>, %arg7: memref<1x128xf32, #tpu.memory_space<vmem>>, %arg8: memref<8x128xf32, #tpu.memory_space<vmem>>) attributes {dimension_semantics = [#tpu.dimension_semantics<parallel>], iteration_bounds = array<i64: 1>, scalar_prefetch = 0 : i64, scratch_operands = 0 : i64, tpu.core_type = #tpu.core_type<tc>, window_params = [{transform_indices = @transform_0, window_bounds = array<i64: 8, 16>}, {pipeline_mode = #tpu.pipeline_mode<synchronous>, transform_indices = @transform_1, window_bounds = array<i64: 16, 128>}, {pipeline_mode = #tpu.pipeline_mode<synchronous>, transform_indices = @transform_2, window_bounds = array<i64: 1, 128>}, {pipeline_mode = #tpu.pipeline_mode<synchronous>, transform_indices = @transform_3, window_bounds = array<i64: 128, 128>}, {pipeline_mode = #tpu.pipeline_mode<synchronous>, transform_indices = @transform_4, window_bounds = array<i64: 1, 128>}, {pipeline_mode = #tpu.pipeline_mode<synchronous>, transform_indices = @transform_5, window_bounds = array<i64: 128, 128>}, {pipeline_mode = #tpu.pipeline_mode<synchronous>, transform_indices = @transform_6, window_bounds = array<i64: 1, 128>}, {transform_indices = @transform_7, window_bounds = array<i64: 8, 128>}]} {
    %c0 = arith.constant 0 : index
    %c0_0 = arith.constant 0 : index
    %0 = vector.load %arg1[%c0, %c0_0] : memref<8x16xf32, #tpu.memory_space<vmem>>, vector<8x16xf32>
    %1 = arith.truncf %0 : vector<8x16xf32> to vector<8x16xbf16>
    %c0_1 = arith.constant 0 : index
    %c0_2 = arith.constant 0 : index
    %2 = vector.load %arg2[%c0_1, %c0_2] : memref<16x128xbf16, #tpu.memory_space<vmem>>, vector<16x128xbf16>
    %cst = arith.constant dense<0.000000e+00> : vector<8x128xf32>
    %3 = tpu.matmul %1, %2, %cst {dimension_numbers = #tpu.dot_dimension_numbers<[1], [0], [0], [1], [0, 0, 1, 1], [], []>} : vector<8x16xbf16>, vector<16x128xbf16>, vector<8x128xf32> -> vector<8x128xf32>
    %c0_3 = arith.constant 0 : index
    %c0_4 = arith.constant 0 : index
    %4 = vector.load %arg3[%c0_3, %c0_4] : memref<1x128xf32, #tpu.memory_space<vmem>>, vector<1x128xf32>
    %5 = vector.broadcast %4 : vector<1x128xf32> to vector<8x128xf32>
    %6 = arith.addf %3, %5 : vector<8x128xf32>
    %7 = math.tanh %6 : vector<8x128xf32>
    %8 = arith.truncf %7 : vector<8x128xf32> to vector<8x128xbf16>
    %c0_5 = arith.constant 0 : index
    %c0_6 = arith.constant 0 : index
    %9 = vector.load %arg4[%c0_5, %c0_6] : memref<128x128xbf16, #tpu.memory_space<vmem>>, vector<128x128xbf16>
    %cst_7 = arith.constant dense<0.000000e+00> : vector<8x128xf32>
    %10 = tpu.matmul %8, %9, %cst_7 {dimension_numbers = #tpu.dot_dimension_numbers<[1], [0], [0], [1], [0, 0, 1, 1], [], []>} : vector<8x128xbf16>, vector<128x128xbf16>, vector<8x128xf32> -> vector<8x128xf32>
    %c0_8 = arith.constant 0 : index
    %c0_9 = arith.constant 0 : index
    %11 = vector.load %arg5[%c0_8, %c0_9] : memref<1x128xf32, #tpu.memory_space<vmem>>, vector<1x128xf32>
    %12 = vector.broadcast %11 : vector<1x128xf32> to vector<8x128xf32>
    %13 = arith.addf %10, %12 : vector<8x128xf32>
    %14 = math.tanh %13 : vector<8x128xf32>
    %15 = arith.truncf %14 : vector<8x128xf32> to vector<8x128xbf16>
    %c0_10 = arith.constant 0 : index
    %c0_11 = arith.constant 0 : index
    %16 = vector.load %arg6[%c0_10, %c0_11] : memref<128x128xbf16, #tpu.memory_space<vmem>>, vector<128x128xbf16>
    %cst_12 = arith.constant dense<0.000000e+00> : vector<8x128xf32>
    %17 = tpu.matmul %15, %16, %cst_12 {dimension_numbers = #tpu.dot_dimension_numbers<[1], [0], [0], [1], [0, 0, 1, 1], [], []>} : vector<8x128xbf16>, vector<128x128xbf16>, vector<8x128xf32> -> vector<8x128xf32>
    %c0_13 = arith.constant 0 : index
    %c0_14 = arith.constant 0 : index
    %18 = vector.load %arg7[%c0_13, %c0_14] : memref<1x128xf32, #tpu.memory_space<vmem>>, vector<1x128xf32>
    %19 = vector.broadcast %18 : vector<1x128xf32> to vector<8x128xf32>
    %20 = arith.addf %17, %19 : vector<8x128xf32>
    %21 = tpu.iota {dimensions = array<i32: 1>} : vector<8x128xi32>
    %c6_i32 = arith.constant 6 : i32
    %22 = vector.broadcast %c6_i32 : i32 to vector<8x128xi32>
    %23 = arith.cmpi slt, %21, %22 : vector<8x128xi32>
    %c6_i32_15 = arith.constant 6 : i32
    %24 = vector.broadcast %c6_i32_15 : i32 to vector<8x128xi32>
    %25 = arith.cmpi eq, %21, %24 : vector<8x128xi32>
    %cst_16 = arith.constant 0.000000e+00 : f32
    %26 = vector.broadcast %cst_16 : f32 to vector<8x128xf32>
    %27 = arith.select %25, %20, %26 : vector<8x128xi1>, vector<8x128xf32>
    %cst_17 = arith.constant dense<0.000000e+00> : vector<8xf32>
    %28 = vector.multi_reduction <add>, %27, %cst_17 [1] : vector<8x128xf32> to vector<8xf32>
    %29 = vector.shape_cast %28 : vector<8xf32> to vector<8x1xf32>
    %cst_18 = arith.constant -1.000000e+30 : f32
    %30 = vector.broadcast %cst_18 : f32 to vector<8x128xf32>
    %31 = arith.select %23, %20, %30 : vector<8x128xi1>, vector<8x128xf32>
    %cst_19 = arith.constant dense<0xFF800000> : vector<8xf32>
    %32 = vector.multi_reduction <maximumf>, %31, %cst_19 [1] : vector<8x128xf32> to vector<8xf32>
    %33 = vector.shape_cast %32 : vector<8xf32> to vector<8x1xf32>
    %34 = vector.broadcast %33 : vector<8x1xf32> to vector<8x128xf32>
    %35 = arith.subf %20, %34 : vector<8x128xf32>
    %36 = math.exp %35 : vector<8x128xf32>
    %cst_20 = arith.constant 0.000000e+00 : f32
    %37 = vector.broadcast %cst_20 : f32 to vector<8x128xf32>
    %38 = arith.select %23, %36, %37 : vector<8x128xi1>, vector<8x128xf32>
    %cst_21 = arith.constant dense<0.000000e+00> : vector<8xf32>
    %39 = vector.multi_reduction <add>, %38, %cst_21 [1] : vector<8x128xf32> to vector<8xf32>
    %40 = vector.shape_cast %39 : vector<8xf32> to vector<8x1xf32>
    %41 = math.log %40 : vector<8x1xf32>
    %42 = vector.broadcast %33 : vector<8x1xf32> to vector<8x128xf32>
    %43 = arith.cmpf oeq, %31, %42 : vector<8x128xf32>
    %44 = arith.andi %43, %23 : vector<8x128xi1>
    %c128_i32 = arith.constant 128 : i32
    %45 = vector.broadcast %c128_i32 : i32 to vector<8x128xi32>
    %46 = arith.select %44, %21, %45 : vector<8x128xi1>, vector<8x128xi32>
    %cst_22 = arith.constant dense<2147483647> : vector<8xi32>
    %47 = vector.multi_reduction <minsi>, %46, %cst_22 [1] : vector<8x128xi32> to vector<8xi32>
    %48 = vector.shape_cast %47 : vector<8xi32> to vector<8x1xi32>
    %49 = arith.sitofp %48 : vector<8x1xi32> to vector<8x1xf32>
    %cst_23 = arith.constant 0.000000e+00 : f32
    %50 = vector.broadcast %cst_23 : f32 to vector<8x1xf32>
    %51 = arith.subf %50, %41 : vector<8x1xf32>
    %52 = tpu.reciprocal %40 {approx = true} : vector<8x1xf32> -> vector<8x1xf32>
    %53 = vector.broadcast %52 : vector<8x1xf32> to vector<8x128xf32>
    %54 = arith.mulf %38, %53 : vector<8x128xf32>
    %55 = vector.broadcast %33 : vector<8x1xf32> to vector<8x128xf32>
    %56 = arith.subf %20, %55 : vector<8x128xf32>
    %57 = vector.broadcast %41 : vector<8x1xf32> to vector<8x128xf32>
    %58 = arith.subf %56, %57 : vector<8x128xf32>
    %59 = arith.mulf %54, %58 : vector<8x128xf32>
    %cst_24 = arith.constant 0.000000e+00 : f32
    %60 = vector.broadcast %cst_24 : f32 to vector<8x128xf32>
    %61 = arith.select %23, %59, %60 : vector<8x128xi1>, vector<8x128xf32>
    %cst_25 = arith.constant dense<0.000000e+00> : vector<8xf32>
    %62 = vector.multi_reduction <add>, %61, %cst_25 [1] : vector<8x128xf32> to vector<8xf32>
    %63 = vector.shape_cast %62 : vector<8xf32> to vector<8x1xf32>
    %cst_26 = arith.constant 0.000000e+00 : f32
    %64 = vector.broadcast %cst_26 : f32 to vector<8x1xf32>
    %65 = arith.subf %64, %63 : vector<8x1xf32>
    %c0_i32 = arith.constant 0 : i32
    %66 = vector.broadcast %c0_i32 : i32 to vector<8x128xi32>
    %67 = arith.cmpi eq, %21, %66 : vector<8x128xi32>
    %cst_27 = arith.constant 0.000000e+00 : f32
    %68 = vector.shape_cast %29 : vector<8x1xf32> to vector<8x1xf32>
    %69 = vector.broadcast %68 : vector<8x1xf32> to vector<8x128xf32>
    %70 = vector.broadcast %cst_27 : f32 to vector<8x128xf32>
    %71 = arith.select %67, %69, %70 : vector<8x128xi1>, vector<8x128xf32>
    %c1_i32 = arith.constant 1 : i32
    %72 = vector.broadcast %c1_i32 : i32 to vector<8x128xi32>
    %73 = arith.cmpi eq, %21, %72 : vector<8x128xi32>
    %cst_28 = arith.constant 0.000000e+00 : f32
    %74 = vector.shape_cast %49 : vector<8x1xf32> to vector<8x1xf32>
    %75 = vector.broadcast %74 : vector<8x1xf32> to vector<8x128xf32>
    %76 = vector.broadcast %cst_28 : f32 to vector<8x128xf32>
    %77 = arith.select %73, %75, %76 : vector<8x128xi1>, vector<8x128xf32>
    %78 = arith.addf %71, %77 : vector<8x128xf32>
    %c2_i32 = arith.constant 2 : i32
    %79 = vector.broadcast %c2_i32 : i32 to vector<8x128xi32>
    %80 = arith.cmpi eq, %21, %79 : vector<8x128xi32>
    %cst_29 = arith.constant 0.000000e+00 : f32
    %81 = vector.shape_cast %51 : vector<8x1xf32> to vector<8x1xf32>
    %82 = vector.broadcast %81 : vector<8x1xf32> to vector<8x128xf32>
    %83 = vector.broadcast %cst_29 : f32 to vector<8x128xf32>
    %84 = arith.select %80, %82, %83 : vector<8x128xi1>, vector<8x128xf32>
    %85 = arith.addf %78, %84 : vector<8x128xf32>
    %c3_i32 = arith.constant 3 : i32
    %86 = vector.broadcast %c3_i32 : i32 to vector<8x128xi32>
    %87 = arith.cmpi eq, %21, %86 : vector<8x128xi32>
    %cst_30 = arith.constant 0.000000e+00 : f32
    %88 = vector.shape_cast %65 : vector<8x1xf32> to vector<8x1xf32>
    %89 = vector.broadcast %88 : vector<8x1xf32> to vector<8x128xf32>
    %90 = vector.broadcast %cst_30 : f32 to vector<8x128xf32>
    %91 = arith.select %87, %89, %90 : vector<8x128xi1>, vector<8x128xf32>
    %92 = arith.addf %85, %91 : vector<8x128xf32>
    %c0_31 = arith.constant 0 : index
    %c0_32 = arith.constant 0 : index
    %93 = vector.load %arg8[%c0_31, %c0_32] : memref<8x128xf32, #tpu.memory_space<vmem>>, vector<8x128xf32>
    tpu.vector_store %arg8[%c0_31, %c0_32], %92 {strides = array<i32>} : memref<8x128xf32, #tpu.memory_space<vmem>>, vector<8x128xf32>,
    return
  }
  func.func @transform_0(%arg0: i32) -> (i32, i32) {
    %c0_i32 = arith.constant 0 : i32
    %c0_i32_0 = arith.constant 0 : i32
    return %arg0, %c0_i32 : i32, i32
  }
  func.func @transform_1(%arg0: i32) -> (i32, i32) {
    %c0_i32 = arith.constant 0 : i32
    %c0_i32_0 = arith.constant 0 : i32
    %c0_i32_1 = arith.constant 0 : i32
    return %c0_i32, %c0_i32_0 : i32, i32
  }
  func.func @transform_2(%arg0: i32) -> (i32, i32) {
    %c0_i32 = arith.constant 0 : i32
    %c0_i32_0 = arith.constant 0 : i32
    %c0_i32_1 = arith.constant 0 : i32
    return %c0_i32, %c0_i32_0 : i32, i32
  }
  func.func @transform_3(%arg0: i32) -> (i32, i32) {
    %c0_i32 = arith.constant 0 : i32
    %c0_i32_0 = arith.constant 0 : i32
    %c0_i32_1 = arith.constant 0 : i32
    return %c0_i32, %c0_i32_0 : i32, i32
  }
  func.func @transform_4(%arg0: i32) -> (i32, i32) {
    %c0_i32 = arith.constant 0 : i32
    %c0_i32_0 = arith.constant 0 : i32
    %c0_i32_1 = arith.constant 0 : i32
    return %c0_i32, %c0_i32_0 : i32, i32
  }
  func.func @transform_5(%arg0: i32) -> (i32, i32) {
    %c0_i32 = arith.constant 0 : i32
    %c0_i32_0 = arith.constant 0 : i32
    %c0_i32_1 = arith.constant 0 : i32
    return %c0_i32, %c0_i32_0 : i32, i32
  }
  func.func @transform_6(%arg0: i32) -> (i32, i32) {
    %c0_i32 = arith.constant 0 : i32
    %c0_i32_0 = arith.constant 0 : i32
    %c0_i32_1 = arith.constant 0 : i32
    return %c0_i32, %c0_i32_0 : i32, i32
  }
  func.func @transform_7(%arg0: i32) -> (i32, i32) {
    %c0_i32 = arith.constant 0 : i32
    %c0_i32_0 = arith.constant 0 : i32
    return %arg0, %c0_i32 : i32, i32
  }
}

</mosaic_0001>

<bundles_post_ra>
// kernel: policy_act.1
= control target key start
LH: loop header
LB: loop body
LE: loop exit
PB: predicated region body
PF: predicated region fallthrough
CT: control target
= control target key end

     0   :  { %12 = vsyncpa [#allocation3], 0  ;;  %s760_s0 = inlined_call_operand.hbm [shape: f32[8,16], index: 0, kind: input, shape index: {}]   ;;  %s761_s1 = inlined_call_operand.hbm [shape: bf16[16,128], index: 1, kind: input, shape index: {}]   ;;  %s762_s2 = inlined_call_operand.vmem [shape: f32[1,128], index: 2, kind: input, shape index: {}]   ;;  %s763_s3 = inlined_call_operand.hbm [shape: bf16[128,128], index: 3, kind: input, shape index: {}]   ;;  %s764_s4 = inlined_call_operand.vmem [shape: f32[1,128], index: 4, kind: input, shape index: {}]   ;;  %s765_s5 = inlined_call_operand.hbm [shape: bf16[128,128], index: 5, kind: input, shape index: {}]   ;;  %s766_s6 = inlined_call_operand.vmem [shape: f32[1,128], index: 6, kind: input, shape index: {}]   ;;  %s767_s7 = inlined_call_operand.vmem [shape: f32[8,128], index: 7, kind: output, shape index: {}]  }
   0x1   :  { %13 = vsyncpa [#allocation5], 0 }
   0x2   :  { %14 = vsyncpa [#allocation8], 0  ;;  %s639_s24 = smov [#allocation4]  }
   0x3   :  { %s30_s25 = sshll.u32 %s639_s24, 4  ;;  %s31_s25 = int_to_ptr.vmem [resolvable:$true] %s30_s25 }
   0x4   :  { %s561_s26 = scalar_lea.vmem %s31_s25, 128  ;;  %p566_p1 = scmp.lt.s32.totalorder %s31_s25, %s31_s25 }
   0x5   :  { %p562_p0 = scmp.ne.s32.totalorder %s31_s25, %s561_s26  ;;  %p567_p2 = scmp.lt.s32.totalorder %s561_s26, %s561_s26 }
   0x7   :  { %p568_p3 = por %p567_p2, %p566_p1 }
   0x9   :  { %p569_p4 = pnand %p568_p3, %p562_p0 }
   0xb   :  { %572 = shalt.err (!%p569_p4)
}
   0xc   :  { %s640_s27 = smov 64   ;;  %s641_s28 = smov 4  }
   0xd   :  { %36 = dma.hbm_to_vmem [thread:$0]  %s761_s1, 128, %s31_s25, [#allocation5], %s640_s27, %s640_s27, %s641_s28  }
   0xe   :  { %s642_s8 = smov [#allocation2]   ;;  %s643_s10 = smov [#allocation6]  }
   0xf   :  { %s21_s9 = sshll.u32 %s642_s8, 4  ;;  %s44_s11 = sshll.u32 %s643_s10, 4  ;;  %s22_s9 = int_to_ptr.vmem [resolvable:$true] %s21_s9  ;;  %s45_s11 = int_to_ptr.vmem [resolvable:$true] %s44_s11 }
  0x10   :  { %s581_s12 = scalar_lea.vmem %s22_s9, 128  ;;  %p586_p6 = scmp.lt.s32.totalorder %s22_s9, %s22_s9 }
  0x11   :  { %p582_p5 = scmp.ne.s32.totalorder %s22_s9, %s581_s12  ;;  %p587_p7 = scmp.lt.s32.totalorder %s581_s12, %s581_s12 }
  0x13   :  { %p588_p8 = por %p587_p7, %p586_p6 }
  0x15   :  { %p589_p9 = pnand %p588_p8, %p582_p5 }
  0x17   :  { %592 = shalt.err (!%p589_p9)
}
  0x18   :  { %24 = dma.hbm_to_vmem [thread:$0]  %s760_s0, 128, %s22_s9, [#allocation3]  }
  0x19   :  { %s601_s15 = scalar_lea.vmem %s45_s11, 1024  ;;  %p606_p11 = scmp.lt.s32.totalorder %s45_s11, %s45_s11 }
  0x1a   :  { %p602_p10 = scmp.ne.s32.totalorder %s45_s11, %s601_s15  ;;  %p607_p12 = scmp.lt.s32.totalorder %s601_s15, %s601_s15 }
  0x1c   :  { %p608_p13 = por %p607_p12, %p606_p11 }
  0x1e   :  { %p609_p0 = pnand %p608_p13, %p602_p10 }
  0x20   :  { %612 = shalt.err (!%p609_p0)
}
  0x21   :  { %50 = dma.hbm_to_vmem [thread:$0]  %s763_s3, 1024, %s45_s11, [#allocation5], %s640_s27, %s640_s27, %s641_s28  }
  0x22   :  { %s644_s17 = smov [#allocation7]  }
  0x23   :  { %s58_s18 = sshll.u32 %s644_s17, 4  ;;  %s59_s18 = int_to_ptr.vmem [resolvable:$true] %s58_s18 }
  0x24   :  { %s621_s19 = scalar_lea.vmem %s59_s18, 1024  ;;  %p626_p2 = scmp.lt.s32.totalorder %s59_s18, %s59_s18 }
  0x25   :  { %p622_p1 = scmp.ne.s32.totalorder %s59_s18, %s621_s19  ;;  %p627_p3 = scmp.lt.s32.totalorder %s621_s19, %s621_s19 }
  0x27   :  { %p628_p4 = por %p627_p3, %p626_p2 }
  0x29   :  { %p629_p5 = pnand %p628_p4, %p622_p1 }
  0x2b   :  { %632 = shalt.err (!%p629_p5)
}
  0x2c   :  { %64 = dma.hbm_to_vmem [thread:$0]  %s765_s5, 1024, %s59_s18, [#allocation8], %s640_s27, %s640_s27, %s641_s28  }
  0x2d   :  { %633 = dma.done.wait [#allocation3], 128  }
  0x2e   :  { %634 = vsyncadd [#allocation3], 4294967168 }
  0x2f   :  { %635 = dma.done.wait [#allocation5], 1152  }
  0x30   :  { %636 = vsyncadd [#allocation5], 4294966144 }
  0x31   :  { %637 = dma.done.wait [#allocation8], 1024  }
  0x32   :  { %638 = vsyncadd [#allocation8], 4294966272  ;;  %v645_v0 = vmov 0.0   ;;  %vm646_vm0 = vmmov 0   ;;  %v526_v1 = vld [vmem:[#allocation4] sm:$0xff]   ;;  %v80_v2 = vld [vmem:[#allocation2] sm:$0xff]  ;;  %v367_v36 = vlaneseq }
  0x33   :  { %472 = vmatprep.subr.bf16.mxu0 %v645_v0  ;;  %474 = vmatprep.mubr.msk.bf16.mxu0 %vm646_vm0, %v645_v0  ;;  %v81_v3 = vpack.c.bf16 %v80_v2, %v80_v2  ;;  %vm97_vm1 = vcmask 130048   ;;  %v527_v4 = vld [vmem:[#allocation6 + $0x38] sm:$0xff]   ;;  %v528_v5 = vld [vmem:[#allocation6 + $0x30] sm:$0xff]   ;;  %v529_v6 = vld [vmem:[#allocation6 + $0x28] sm:$0xff]  }
  0x34   :  { %478 = vmatprep.subr.bf16.mxu1 %v645_v0  ;;  %494 = vmatprep.mubr.msk.bf16.mxu1 %vm646_vm0, %v645_v0  ;;  %v530_v7 = vld [vmem:[#allocation6 + $0x20] sm:$0xff]   ;;  %v531_v8 = vld [vmem:[#allocation6 + $0x18] sm:$0xff]   ;;  %v532_v9 = vld [vmem:[#allocation6 + $0x10] sm:$0xff]   ;;  %v737_v37 = vand.u32 127, %v367_v36 }
  0x35   :  { %473 = vmatpush3.bf16.msra.mxu0 %v526_v1  ;;  %479 = vmatpush3.bf16.msra.mxu1 %v527_v4  ;;  %v533_v10 = vld [vmem:[#allocation6 + $0x8] sm:$0xff]   ;;  %v534_v11 = vld [vmem:[#allocation6] sm:$0xff]   ;;  %v535_v12 = vld [vmem:[#allocation7 + $0x38] sm:$0xff]  }
  0x36   :  { %498 = vmatprep.subr.bf16.mxu0 %v645_v0  ;;  %480 = vmatprep.subr.bf16.mxu1 %v645_v0  ;;  %v536_v13 = vld [vmem:[#allocation7 + $0x30] sm:$0xff]   ;;  %v537_v14 = vld [vmem:[#allocation7 + $0x28] sm:$0xff]   ;;  %v538_v23 = vld [vmem:[#allocation7 + $0x20] sm:$0xff]   ;;  %vm369_vm2 = vcmp.lt.s32.totalorder %v737_v37, 6  ;;  %vm370_vm5 = vcmp.eq.s32.totalorder %v737_v37, 6  ;;  %vm414_vm7 = vcmp.eq.s32.totalorder %v737_v37, 1 }
  0x37   :  { %v431_v15 = vld [vmem:[%s762_s2] ss:$0 sm:$0xff]  ;;  %v539_v24 = vld [vmem:[#allocation7 + $0x18] sm:$0xff]   ;;  %v541_v26 = vld [vmem:[#allocation7 + $0x8] sm:$0xff]   ;;  %vm412_vm8 = vcmp.eq.s32.totalorder %v737_v37, 0  ;;  %vm417_vm9 = vcmp.eq.s32.totalorder %v737_v37, 2 }
  0x38   :  { %475 = vmatmul.mubr.msk.bf16.vlgmr.msra.gmra.mxu0 %vm97_vm1, %v81_v3  ;;  %v540_v25 = vld [vmem:[#allocation7 + $0x10] sm:$0xff]   ;;  %v542_v27 = vld [vmem:[#allocation7] sm:$0xff]   ;;  %vm420_vm10 = vcmp.eq.s32.totalorder %v737_v37, 3 }
  0x39   :  { %514 = vmatprep.mubr.msk.bf16.mxu0 %vm646_vm0, %v645_v0  ;;  %481 = vmatpush3.bf16.msra.mxu1 %v528_v5  ;;  %v434_v28 = vld [vmem:[%s764_s4] ss:$0 sm:$0xff] }
  0x3a   :  { %482 = vmatprep.subr.bf16.mxu1 %v645_v0  ;;  %499 = vmatpush3.bf16.msra.mxu0 %v535_v12  ;;  %v443_v38 = vld [vmem:[%s766_s6] ss:$0 sm:$0xff] }
  0x3b   :  { %500 = vmatprep.subr.bf16.mxu0 %v645_v0 }
  0x3d   :  { %483 = vmatpush3.bf16.msra.mxu1 %v529_v6 }
  0x3e   :  { %484 = vmatprep.subr.bf16.mxu1 %v645_v0  ;;  %501 = vmatpush3.bf16.msra.mxu0 %v536_v13 }
  0x3f   :  { %502 = vmatprep.subr.bf16.mxu0 %v645_v0 }
  0x41   :  { %485 = vmatpush3.bf16.msra.mxu1 %v530_v7 }
  0x42   :  { %486 = vmatprep.subr.bf16.mxu1 %v645_v0  ;;  %503 = vmatpush3.bf16.msra.mxu0 %v537_v14 }
  0x43   :  { %504 = vmatprep.subr.bf16.mxu0 %v645_v0 }
  0x45   :  { %487 = vmatpush3.bf16.msra.mxu1 %v531_v8 }
  0x46   :  { %488 = vmatprep.subr.bf16.mxu1 %v645_v0  ;;  %505 = vmatpush3.bf16.msra.mxu0 %v538_v23 }
  0x47   :  { %506 = vmatprep.subr.bf16.mxu0 %v645_v0 }
  0x49   :  { %489 = vmatpush3.bf16.msra.mxu1 %v532_v9 }
  0x4a   :  { %490 = vmatprep.subr.bf16.mxu1 %v645_v0  ;;  %507 = vmatpush3.bf16.msra.mxu0 %v539_v24 }
  0x4b   :  { %508 = vmatprep.subr.bf16.mxu0 %v645_v0 }
  0x4d   :  { %491 = vmatpush3.bf16.msra.mxu1 %v533_v10 }
  0x4e   :  { %492 = vmatprep.subr.bf16.mxu1 %v645_v0  ;;  %509 = vmatpush3.bf16.msra.mxu0 %v540_v25 }
  0x4f   :  { %510 = vmatprep.subr.bf16.mxu0 %v645_v0 }
  0x51   :  { %493 = vmatpush3.bf16.msra.mxu1 %v534_v11 }
  0x52   :  { %511 = vmatpush3.bf16.msra.mxu0 %v541_v26 }
  0x53   :  { %512 = vmatprep.subr.bf16.mxu0 %v645_v0 }
  0x56   :  { %513 = vmatpush3.bf16.msra.mxu0 %v542_v27 }
  0xf8   :  { %v135_v16 = vpop.f32.mrf.mxu0 }
  0xf9   :  { %v136_v17 = vadd.f32 %v431_v15, %v135_v16 }
  0xfa   :  { %v476_v18 = vpop.f32.mrf.mxu0 }
  0xfb   :  { %543 = vtanh.f32 %v136_v17 }
  0xfc   :  { %v138_v19 = vpop.f32.mrf.mxu0 }
  0xfe   :  { %v477_v20 = vpop.f32.mrf.mxu0 }
 0x108   :  { %v544_v21 = vpop.eup %543 }
 0x109   :  { %v142_v22 = vpack.c.bf16 %v544_v21, %v544_v21 }
 0x10b   :  { %495 = vmatmul.mubr.bf16.vlgmr.msra.gmra.mxu1 %v142_v22 }
 0x1cb   :  { %v248_v29 = vpop.f32.mrf.mxu1 }
 0x1cc   :  { %v249_v30 = vadd.f32 %v434_v28, %v248_v29 }
 0x1cd   :  { %v496_v31 = vpop.f32.mrf.mxu1 }
 0x1ce   :  { %545 = vtanh.f32 %v249_v30 }
 0x1cf   :  { %v251_v32 = vpop.f32.mrf.mxu1 }
 0x1d1   :  { %v497_v33 = vpop.f32.mrf.mxu1 }
 0x1db   :  { %v546_v34 = vpop.eup %545 }
 0x1dc   :  { %v255_v35 = vpack.c.bf16 %v546_v34, %v546_v34 }
 0x1de   :  { %515 = vmatmul.mubr.bf16.vlgmr.msra.gmra.mxu0 %v255_v35 }
 0x29e   :  { %v361_v39 = vpop.f32.mrf.mxu0 }
 0x29f   :  { %v362_v40 = vadd.f32 %v443_v38, %v361_v39 }
 0x2a0   :  { %v516_v41 = vpop.f32.mrf.mxu0 }
 0x2a1   :  { %v374_v42 = vsel %vm369_vm2, %v362_v40, -1e+30  ;;  %v371_v53 = vsel %vm370_vm5, %v362_v40, 0.0 }
 0x2a2   :  { %375 = vmax.xlane.f32.xlu0 %v374_v42  ;;  %v364_v43 = vpop.f32.mrf.mxu0 }
 0x2a4   :  { %v517_v44 = vpop.f32.mrf.mxu0 }
 0x32b   :  { %v376_v45 = vpop.xlane.xlu0 %375 }
 0x32c   :  { %v377_v46 = vsub.f32 %v362_v40, %v376_v45  ;;  %vm385_vm3 = vcmp.eq.f32.partialorder %v374_v42, %v376_v45 }
 0x32d   :  { %vm386_vm4 = vmand %vm385_vm3, %vm369_vm2 }
 0x32e   :  { %v378_v47 = vmul.f32 1.442695, %v377_v46  ;;  %v387_v48 = vsel %vm386_vm4, %v737_v37, 128 }
 0x32f   :  { %v389_v49 = vshra.s32 %v387_v48, 16  ;;  %v388_v54 = vand.u32 65535, %v387_v48 }
 0x330   :  { %547 = vpow2.f32 %v378_v47 }
 0x331   :  { %v391_v50 = vcvt.s32.f32 %v389_v49  ;;  %v390_v56 = vcvt.s32.f32 %v388_v54 }
 0x333   :  { %392 = vmin.xlane.f32.xlu1 %v391_v50 }
 0x33d   :  { %v548_v51 = vpop.eup %547 }
 0x33e   :  { %v380_v52 = vsel %vm369_vm2, %v548_v51, 0.0 }
 0x33f   :  { %381 = vadd.xlane.f32.xlu0 %v380_v52 }
 0x343   :  { %372 = vadd.xlane.f32.xlu0 %v371_v53 }
 0x3bc   :  { %v393_v55 = vpop.xlane.xlu1 %392 }
 0x3bd   :  { %vm394_vm6 = vcmp.eq.f32.partialorder %v391_v50, %v393_v55  ;;  %v399_v3 = vcvt.f32.s32 %v393_v55 }
 0x3be   :  { %v395_v57 = vsel %vm394_vm6, %v390_v56, inf }
 0x3bf   :  { %396 = vmin.xlane.f32.xlu1 %v395_v57  ;;  %v400_v5 = vshll.u32 %v399_v3, 16 }
 0x3c8   :  { %v382_v58 = vpop.xlane.xlu0 %381 }
 0x3c9   :  { %549 = vlog2.f32 %v382_v58 }
 0x3ca   :  { %551 = vrcp.f32 %v382_v58 }
 0x3cc   :  { %v373_v8 = vpop.xlane.xlu0 %372 }
 0x3cd   :  { %v413_v11 = vsel %vm412_vm8, %v373_v8, 0.0 }
 0x3d6   :  { %v550_v59 = vpop.eup %549 }
 0x3d7   :  { %v552_v60 = vpop.eup %551  ;;  %v384_v61 = vmul.f32 0.6931472, %v550_v59 }
 0x3d8   :  { %v405_v62 = vmul.f32 %v552_v60, %v380_v52 }
 0x3d9   :  { %v406_v63 = vsub.f32 %v377_v46, %v384_v61  ;;  %v403_v10 = vsub.f32 0.0, %v384_v61 }
 0x3db   :  { %v407_v0 = vmul.f32 %v406_v63, %v405_v62  ;;  %v418_v15 = vsel %vm417_vm9, %v403_v10, 0.0 }
 0x3dd   :  { %v408_v1 = vsel %vm369_vm2, %v407_v0, 0.0 }
 0x3de   :  { %409 = vadd.xlane.f32.xlu1 %v408_v1 }
 0x448   :  { %v397_v2 = vpop.xlane.xlu1 %396 }
 0x449   :  { %v398_v4 = vcvt.f32.s32 %v397_v2 }
 0x44b   :  { %v401_v6 = vadd.s32 %v400_v5, %v398_v4 }
 0x44d   :  { %v402_v7 = vcvt.s32.f32 %v401_v6 }
 0x44f   :  { %v415_v9 = vsel %vm414_vm7, %v402_v7, 0.0 }
 0x450   :  { %v416_v12 = vadd.f32 %v415_v9, %v413_v11 }
 0x452   :  { %v419_v16 = vadd.f32 %v418_v15, %v416_v12 }
 0x467   :  { %v410_v13 = vpop.xlane.xlu1 %409 }
 0x468   :  { %v411_v14 = vsub.f32 0.0, %v410_v13 }
 0x46a   :  { %v421_v17 = vsel %vm420_vm10, %v411_v14, 0.0 }
 0x46b   :  { %v422_v18 = vadd.f32 %v421_v17, %v419_v16 }
 0x46d   :  { %423 = vst [vmem:[%s767_s7] sm:$0xff] %v422_v18 }
 0x46e   :  { %428 = vsyncpa [#allocation3], 1 }
 0x46f   :  { %429 = vsyncpa [#allocation5], 1 }
 0x470   :  { %430 = vsyncpa [#allocation8], 1 }

</bundles_post_ra>
